<compile_context>
chip_gen: v6e
topology: v6e:2x2x1
jax: 0.10.0
libtpu: 0.0.40
codegen_flags: <defaults>
</compile_context>

<pallas_src>
import jax
import jax.numpy as jnp
from jax.experimental import pallas as pl
from jax.experimental.pallas import tpu as pltpu


def _sublane_pack(dtype):
    """Minimum sublane multiple for this dtype (8 for f32, 16 for bf16, 32 for int8)."""
    return 8 * max(1, 4 // jnp.dtype(dtype).itemsize)


def _resident_table_budget_bytes():
    # The auto-pipeliner may double-buffer the resident table block, so keep it well
    # under the default 32 MiB scoped-VMEM limit on every generation (v7x: 64 MiB
    # physical; v5e/v6e: 128 MiB -- raise together with vmem_limit_bytes if bigger
    # resident tables are wanted there).
    try:
        cap = int(pltpu.get_tpu_info().vmem_capacity_bytes)
    except Exception:
        cap = 64 << 20
    return min(12 << 20, cap // 5)


# -----------------------------------------------------------------------------
# Fast path: small vocabulary -> whole table VMEM-resident, in-VMEM row gather.
# -----------------------------------------------------------------------------
def _make_resident_kernel(rows_per_step):
    def kernel(ids_ref, table_ref, out_ref):
        # ids_ref:   (n_pad,) int32 in SMEM (scalar prefetch)
        # table_ref: (V, Dp)  whole embedding table, VMEM-resident
        # out_ref:   (rows_per_step, Dp) lane-dense output tile
        base = pl.program_id(0) * rows_per_step
        for k in range(rows_per_step):  # static unroll: one dynamic-row load + plain store per row
            tok = ids_ref[base + k]
            out_ref[pl.ds(k, 1), :] = table_ref[pl.ds(tok, 1), :]

    return kernel


def _resident_gather(ids, table, *, n_steps, rows_per_step, n_pad):
    V, Dp = table.shape
    grid_spec = pltpu.PrefetchScalarGridSpec(
        num_scalar_prefetch=1,                       # ids land in SMEM
        grid=(n_steps,),
        in_specs=[
            # Full-array block + constant index_map: table is DMA'd once and stays
            # resident across all grid steps.
            pl.BlockSpec((V, Dp), lambda i, ids_ref: (0, 0)),
        ],
        out_specs=pl.BlockSpec((rows_per_step, Dp), lambda i, ids_ref: (i, 0)),
    )
    return pl.pallas_call(
        _make_resident_kernel(rows_per_step),
        out_shape=jax.ShapeDtypeStruct((n_pad, Dp), table.dtype),
        grid_spec=grid_spec,
        compiler_params=pltpu.CompilerParams(
            dimension_semantics=("parallel",),       # v7x: split steps across both TCs
        ),
    )(ids, table)


# -----------------------------------------------------------------------------
# Large-vocab path: manual HBM->HBM row-gather DMA (table never enters VMEM).
# -----------------------------------------------------------------------------
def _make_hbm_gather_kernel(rows_per_step):
    def kernel(ids_ref, table_hbm, out_hbm, copy_sems):
        base = pl.program_id(0) * rows_per_step

        def row_copy(k):
            tok = ids_ref[base + k]
            return pltpu.make_async_copy(
                table_hbm.at[pl.ds(tok, 1), :],       # (1, Dp) row of the table in HBM
                out_hbm.at[pl.ds(base + k, 1), :],    # matching output row in HBM
                copy_sems.at[k],
            )

        # Issue every row DMA of this step (all rows_per_step copies in flight),
        # then drain.  No VMEM staging, no in-body copies.
        # TODO(synk): overlap across grid steps (issue step i+1 while draining step i)
        # with a second semaphore bank if DMA-descriptor latency shows up in traces.
        for k in range(rows_per_step):
            row_copy(k).start()
        for k in range(rows_per_step):
            row_copy(k).wait()

    return kernel


def _hbm_gather(ids, table, *, n_steps, rows_per_step, n_pad):
    _, Dp = table.shape
    grid_spec = pltpu.PrefetchScalarGridSpec(
        num_scalar_prefetch=1,
        grid=(n_steps,),
        in_specs=[pl.BlockSpec(memory_space=pl.ANY)],   # table stays in HBM
        out_specs=pl.BlockSpec(memory_space=pl.ANY),    # output written directly by DMA
        scratch_shapes=[pltpu.SemaphoreType.DMA((rows_per_step,))],
    )
    return pl.pallas_call(
        _make_hbm_gather_kernel(rows_per_step),
        out_shape=jax.ShapeDtypeStruct((n_pad, Dp), table.dtype),
        grid_spec=grid_spec,
        compiler_params=pltpu.CompilerParams(
            dimension_semantics=("parallel",),
        ),
    )(ids, table)


def word_embedding_forward(input_sentence, embedding_table, *,
                           rows_per_step=32, force_hbm_gather=False):
    """Pallas equivalent of word_embedding.forward (nn.Embedding lookup).

    input_sentence:  (B, S) integer token ids
    embedding_table: (V, D) embedding weights
    returns:         (B, S, D)
    """
    B, S = input_sentence.shape
    V, D = embedding_table.shape
    dtype = embedding_table.dtype
    N = B * S

    # Round rows_per_step up to the dtype's sublane packing (8 f32 / 16 bf16 / 32 int8)
    # so the (rows_per_step, Dp) output tiles store unmasked.
    pack = _sublane_pack(dtype)
    rows_per_step = max(int(rows_per_step), pack)
    rows_per_step = ((rows_per_step + pack - 1) // pack) * pack

    # Pad the feature dim to a multiple of 128 -> lane-dense output stores.
    Dp = ((D + 127) // 128) * 128
    table = embedding_table
    if Dp != D:
        table = jnp.pad(table, ((0, 0), (0, Dp - D)))

    n_steps = int(pl.cdiv(N, rows_per_step))
    n_pad = n_steps * rows_per_step

    ids = input_sentence.reshape(-1).astype(jnp.int32)
    # torch.nn.Embedding raises on out-of-range ids; we clamp instead so every row
    # access stays in-bounds (intentional, documented divergence).
    ids = jnp.clip(ids, 0, V - 1)
    if n_pad != N:
        ids = jnp.pad(ids, (0, n_pad - N))   # padded rows are sliced off below

    table_bytes = V * Dp * jnp.dtype(dtype).itemsize
    use_resident = (not force_hbm_gather) and table_bytes <= _resident_table_budget_bytes()

    if use_resident:
        out_flat = _resident_gather(ids, table, n_steps=n_steps,
                                    rows_per_step=rows_per_step, n_pad=n_pad)
    else:
        out_flat = _hbm_gather(ids, table, n_steps=n_steps,
                               rows_per_step=rows_per_step, n_pad=n_pad)

    return out_flat[:N, :D].reshape(B, S, D)


if __name__ == "__main__":
    # Small deterministic setup consistent with the module's __init__:
    #   nn.Embedding(vocab_length, embedding_dim) -> weight ~ N(0, 1)
    vocab_length = 64
    embedding_dim = 128
    batch, seq = 2, 8

    key = jax.random.PRNGKey(0)
    k_table, k_ids = jax.random.split(key)

    embedding_table = jax.random.normal(
        k_table, (vocab_length, embedding_dim), dtype=jnp.float32)
    input_sentence = jax.random.randint(
        k_ids, (batch, seq), minval=0, maxval=vocab_length, dtype=jnp.int32)

    ref = embedding_table[input_sentence]   # reference gather == nn.Embedding lookup

    # Path 1: small-vocab fast path (table VMEM-resident) -- the regime these shapes imply.
    out_fast = jax.block_until_ready(word_embedding_forward(input_sentence, embedding_table))
    assert out_fast.shape == (batch, seq, embedding_dim)
    assert out_fast.dtype == jnp.float32
    assert jnp.allclose(out_fast, ref, atol=1e-6), "fast path mismatch vs reference"

    # Path 2: large-vocab path (HBM->HBM row-gather DMA), forced at small shapes to verify it.
    out_gather = jax.block_until_ready(
        word_embedding_forward(input_sentence, embedding_table, force_hbm_gather=True))
    assert out_gather.shape == (batch, seq, embedding_dim)
    assert jnp.allclose(out_gather, ref, atol=1e-6), "HBM gather path mismatch vs reference"

    print("KERNEL_OK")
</pallas_src>

<mosaic_0001>
module attributes {stable_mosaic.version = 11 : i64} {
  func.func @kernel(%arg0: i32, %arg1: memref<32xi32, #tpu.memory_space<smem>>, %arg2: memref<64x128xf32, #tpu.memory_space<vmem>>, %arg3: memref<32x128xf32, #tpu.memory_space<vmem>>) attributes {dimension_semantics = [#tpu.dimension_semantics<parallel>], iteration_bounds = array<i64: 1>, scalar_prefetch = 1 : i64, scratch_operands = 0 : i64, tpu.core_type = #tpu.core_type<tc>, window_params = [{pipeline_mode = #tpu.pipeline_mode<synchronous>, transform_indices = @transform_0, window_bounds = array<i64: 64, 128>}, {transform_indices = @transform_1, window_bounds = array<i64: 32, 128>}]} {
    %c32_i32 = arith.constant 32 : i32
    %0 = arith.muli %arg0, %c32_i32 : i32
    %c0_i32 = arith.constant 0 : i32
    %1 = arith.addi %0, %c0_i32 : i32
    %2 = arith.index_cast %1 : i32 to index
    %3 = memref.load %arg1[%2] : memref<32xi32, #tpu.memory_space<smem>>
    %4 = arith.index_cast %3 : i32 to index
    %c0 = arith.constant 0 : index
    %5 = vector.load %arg2[%4, %c0] : memref<64x128xf32, #tpu.memory_space<vmem>>, vector<1x128xf32>
    %c0_0 = arith.constant 0 : index
    %c0_1 = arith.constant 0 : index
    %6 = vector.load %arg3[%c0_0, %c0_1] : memref<32x128xf32, #tpu.memory_space<vmem>>, vector<1x128xf32>
    tpu.vector_store %arg3[%c0_0, %c0_1], %5 {strides = array<i32>} : memref<32x128xf32, #tpu.memory_space<vmem>>, vector<1x128xf32>,
    %c1_i32 = arith.constant 1 : i32
    %7 = arith.addi %0, %c1_i32 : i32
    %8 = arith.index_cast %7 : i32 to index
    %9 = memref.load %arg1[%8] : memref<32xi32, #tpu.memory_space<smem>>
    %10 = arith.index_cast %9 : i32 to index
    %c0_2 = arith.constant 0 : index
    %11 = vector.load %arg2[%10, %c0_2] : memref<64x128xf32, #tpu.memory_space<vmem>>, vector<1x128xf32>
    %c1 = arith.constant 1 : index
    %c0_3 = arith.constant 0 : index
    %12 = vector.load %arg3[%c1, %c0_3] : memref<32x128xf32, #tpu.memory_space<vmem>>, vector<1x128xf32>
    tpu.vector_store %arg3[%c1, %c0_3], %11 {strides = array<i32>} : memref<32x128xf32, #tpu.memory_space<vmem>>, vector<1x128xf32>,
    %c2_i32 = arith.constant 2 : i32
    %13 = arith.addi %0, %c2_i32 : i32
    %14 = arith.index_cast %13 : i32 to index
    %15 = memref.load %arg1[%14] : memref<32xi32, #tpu.memory_space<smem>>
    %16 = arith.index_cast %15 : i32 to index
    %c0_4 = arith.constant 0 : index
    %17 = vector.load %arg2[%16, %c0_4] : memref<64x128xf32, #tpu.memory_space<vmem>>, vector<1x128xf32>
    %c2 = arith.constant 2 : index
    %c0_5 = arith.constant 0 : index
    %18 = vector.load %arg3[%c2, %c0_5] : memref<32x128xf32, #tpu.memory_space<vmem>>, vector<1x128xf32>
    tpu.vector_store %arg3[%c2, %c0_5], %17 {strides = array<i32>} : memref<32x128xf32, #tpu.memory_space<vmem>>, vector<1x128xf32>,
    %c3_i32 = arith.constant 3 : i32
    %19 = arith.addi %0, %c3_i32 : i32
    %20 = arith.index_cast %19 : i32 to index
    %21 = memref.load %arg1[%20] : memref<32xi32, #tpu.memory_space<smem>>
    %22 = arith.index_cast %21 : i32 to index
    %c0_6 = arith.constant 0 : index
    %23 = vector.load %arg2[%22, %c0_6] : memref<64x128xf32, #tpu.memory_space<vmem>>, vector<1x128xf32>
    %c3 = arith.constant 3 : index
    %c0_7 = arith.constant 0 : index
    %24 = vector.load %arg3[%c3, %c0_7] : memref<32x128xf32, #tpu.memory_space<vmem>>, vector<1x128xf32>
    tpu.vector_store %arg3[%c3, %c0_7], %23 {strides = array<i32>} : memref<32x128xf32, #tpu.memory_space<vmem>>, vector<1x128xf32>,
    %c4_i32 = arith.constant 4 : i32
    %25 = arith.addi %0, %c4_i32 : i32
    %26 = arith.index_cast %25 : i32 to index
    %27 = memref.load %arg1[%26] : memref<32xi32, #tpu.memory_space<smem>>
    %28 = arith.index_cast %27 : i32 to index
    %c0_8 = arith.constant 0 : index
    %29 = vector.load %arg2[%28, %c0_8] : memref<64x128xf32, #tpu.memory_space<vmem>>, vector<1x128xf32>
    %c4 = arith.constant 4 : index
    %c0_9 = arith.constant 0 : index
    %30 = vector.load %arg3[%c4, %c0_9] : memref<32x128xf32, #tpu.memory_space<vmem>>, vector<1x128xf32>
    tpu.vector_store %arg3[%c4, %c0_9], %29 {strides = array<i32>} : memref<32x128xf32, #tpu.memory_space<vmem>>, vector<1x128xf32>,
    %c5_i32 = arith.constant 5 : i32
    %31 = arith.addi %0, %c5_i32 : i32
    %32 = arith.index_cast %31 : i32 to index
    %33 = memref.load %arg1[%32] : memref<32xi32, #tpu.memory_space<smem>>
    %34 = arith.index_cast %33 : i32 to index
    %c0_10 = arith.constant 0 : index
    %35 = vector.load %arg2[%34, %c0_10] : memref<64x128xf32, #tpu.memory_space<vmem>>, vector<1x128xf32>
    %c5 = arith.constant 5 : index
    %c0_11 = arith.constant 0 : index
    %36 = vector.load %arg3[%c5, %c0_11] : memref<32x128xf32, #tpu.memory_space<vmem>>, vector<1x128xf32>
    tpu.vector_store %arg3[%c5, %c0_11], %35 {strides = array<i32>} : memref<32x128xf32, #tpu.memory_space<vmem>>, vector<1x128xf32>,
    %c6_i32 = arith.constant 6 : i32
    %37 = arith.addi %0, %c6_i32 : i32
    %38 = arith.index_cast %37 : i32 to index
    %39 = memref.load %arg1[%38] : memref<32xi32, #tpu.memory_space<smem>>
    %40 = arith.index_cast %39 : i32 to index
    %c0_12 = arith.constant 0 : index
    %41 = vector.load %arg2[%40, %c0_12] : memref<64x128xf32, #tpu.memory_space<vmem>>, vector<1x128xf32>
    %c6 = arith.constant 6 : index
    %c0_13 = arith.constant 0 : index
    %42 = vector.load %arg3[%c6, %c0_13] : memref<32x128xf32, #tpu.memory_space<vmem>>, vector<1x128xf32>
    tpu.vector_store %arg3[%c6, %c0_13], %41 {strides = array<i32>} : memref<32x128xf32, #tpu.memory_space<vmem>>, vector<1x128xf32>,
    %c7_i32 = arith.constant 7 : i32
    %43 = arith.addi %0, %c7_i32 : i32
    %44 = arith.index_cast %43 : i32 to index
    %45 = memref.load %arg1[%44] : memref<32xi32, #tpu.memory_space<smem>>
    %46 = arith.index_cast %45 : i32 to index
    %c0_14 = arith.constant 0 : index
    %47 = vector.load %arg2[%46, %c0_14] : memref<64x128xf32, #tpu.memory_space<vmem>>, vector<1x128xf32>
    %c7 = arith.constant 7 : index
    %c0_15 = arith.constant 0 : index
    %48 = vector.load %arg3[%c7, %c0_15] : memref<32x128xf32, #tpu.memory_space<vmem>>, vector<1x128xf32>
    tpu.vector_store %arg3[%c7, %c0_15], %47 {strides = array<i32>} : memref<32x128xf32, #tpu.memory_space<vmem>>, vector<1x128xf32>,
    %c8_i32 = arith.constant 8 : i32
    %49 = arith.addi %0, %c8_i32 : i32
    %50 = arith.index_cast %49 : i32 to index
    %51 = memref.load %arg1[%50] : memref<32xi32, #tpu.memory_space<smem>>
    %52 = arith.index_cast %51 : i32 to index
    %c0_16 = arith.constant 0 : index
    %53 = vector.load %arg2[%52, %c0_16] : memref<64x128xf32, #tpu.memory_space<vmem>>, vector<1x128xf32>
    %c8 = arith.constant 8 : index
    %c0_17 = arith.constant 0 : index
    %54 = vector.load %arg3[%c8, %c0_17] : memref<32x128xf32, #tpu.memory_space<vmem>>, vector<1x128xf32>
    tpu.vector_store %arg3[%c8, %c0_17], %53 {strides = array<i32>} : memref<32x128xf32, #tpu.memory_space<vmem>>, vector<1x128xf32>,
    %c9_i32 = arith.constant 9 : i32
    %55 = arith.addi %0, %c9_i32 : i32
    %56 = arith.index_cast %55 : i32 to index
    %57 = memref.load %arg1[%56] : memref<32xi32, #tpu.memory_space<smem>>
    %58 = arith.index_cast %57 : i32 to index
    %c0_18 = arith.constant 0 : index
    %59 = vector.load %arg2[%58, %c0_18] : memref<64x128xf32, #tpu.memory_space<vmem>>, vector<1x128xf32>
    %c9 = arith.constant 9 : index
    %c0_19 = arith.constant 0 : index
    %60 = vector.load %arg3[%c9, %c0_19] : memref<32x128xf32, #tpu.memory_space<vmem>>, vector<1x128xf32>
    tpu.vector_store %arg3[%c9, %c0_19], %59 {strides = array<i32>} : memref<32x128xf32, #tpu.memory_space<vmem>>, vector<1x128xf32>,
    %c10_i32 = arith.constant 10 : i32
    %61 = arith.addi %0, %c10_i32 : i32
    %62 = arith.index_cast %61 : i32 to index
    %63 = memref.load %arg1[%62] : memref<32xi32, #tpu.memory_space<smem>>
    %64 = arith.index_cast %63 : i32 to index
    %c0_20 = arith.constant 0 : index
    %65 = vector.load %arg2[%64, %c0_20] : memref<64x128xf32, #tpu.memory_space<vmem>>, vector<1x128xf32>
    %c10 = arith.constant 10 : index
    %c0_21 = arith.constant 0 : index
    %66 = vector.load %arg3[%c10, %c0_21] : memref<32x128xf32, #tpu.memory_space<vmem>>, vector<1x128xf32>
    tpu.vector_store %arg3[%c10, %c0_21], %65 {strides = array<i32>} : memref<32x128xf32, #tpu.memory_space<vmem>>, vector<1x128xf32>,
    %c11_i32 = arith.constant 11 : i32
    %67 = arith.addi %0, %c11_i32 : i32
    %68 = arith.index_cast %67 : i32 to index
    %69 = memref.load %arg1[%68] : memref<32xi32, #tpu.memory_space<smem>>
    %70 = arith.index_cast %69 : i32 to index
    %c0_22 = arith.constant 0 : index
    %71 = vector.load %arg2[%70, %c0_22] : memref<64x128xf32, #tpu.memory_space<vmem>>, vector<1x128xf32>
    %c11 = arith.constant 11 : index
    %c0_23 = arith.constant 0 : index
    %72 = vector.load %arg3[%c11, %c0_23] : memref<32x128xf32, #tpu.memory_space<vmem>>, vector<1x128xf32>
    tpu.vector_store %arg3[%c11, %c0_23], %71 {strides = array<i32>} : memref<32x128xf32, #tpu.memory_space<vmem>>, vector<1x128xf32>,
    %c12_i32 = arith.constant 12 : i32
    %73 = arith.addi %0, %c12_i32 : i32
    %74 = arith.index_cast %73 : i32 to index
    %75 = memref.load %arg1[%74] : memref<32xi32, #tpu.memory_space<smem>>
    %76 = arith.index_cast %75 : i32 to index
    %c0_24 = arith.constant 0 : index
    %77 = vector.load %arg2[%76, %c0_24] : memref<64x128xf32, #tpu.memory_space<vmem>>, vector<1x128xf32>
    %c12 = arith.constant 12 : index
    %c0_25 = arith.constant 0 : index
    %78 = vector.load %arg3[%c12, %c0_25] : memref<32x128xf32, #tpu.memory_space<vmem>>, vector<1x128xf32>
    tpu.vector_store %arg3[%c12, %c0_25], %77 {strides = array<i32>} : memref<32x128xf32, #tpu.memory_space<vmem>>, vector<1x128xf32>,
    %c13_i32 = arith.constant 13 : i32
    %79 = arith.addi %0, %c13_i32 : i32
    %80 = arith.index_cast %79 : i32 to index
    %81 = memref.load %arg1[%80] : memref<32xi32, #tpu.memory_space<smem>>
    %82 = arith.index_cast %81 : i32 to index
    %c0_26 = arith.constant 0 : index
    %83 = vector.load %arg2[%82, %c0_26] : memref<64x128xf32, #tpu.memory_space<vmem>>, vector<1x128xf32>
    %c13 = arith.constant 13 : index
    %c0_27 = arith.constant 0 : index
    %84 = vector.load %arg3[%c13, %c0_27] : memref<32x128xf32, #tpu.memory_space<vmem>>, vector<1x128xf32>
    tpu.vector_store %arg3[%c13, %c0_27], %83 {strides = array<i32>} : memref<32x128xf32, #tpu.memory_space<vmem>>, vector<1x128xf32>,
    %c14_i32 = arith.constant 14 : i32
    %85 = arith.addi %0, %c14_i32 : i32
    %86 = arith.index_cast %85 : i32 to index
    %87 = memref.load %arg1[%86] : memref<32xi32, #tpu.memory_space<smem>>
    %88 = arith.index_cast %87 : i32 to index
    %c0_28 = arith.constant 0 : index
    %89 = vector.load %arg2[%88, %c0_28] : memref<64x128xf32, #tpu.memory_space<vmem>>, vector<1x128xf32>
    %c14 = arith.constant 14 : index
    %c0_29 = arith.constant 0 : index
    %90 = vector.load %arg3[%c14, %c0_29] : memref<32x128xf32, #tpu.memory_space<vmem>>, vector<1x128xf32>
    tpu.vector_store %arg3[%c14, %c0_29], %89 {strides = array<i32>} : memref<32x128xf32, #tpu.memory_space<vmem>>, vector<1x128xf32>,
    %c15_i32 = arith.constant 15 : i32
    %91 = arith.addi %0, %c15_i32 : i32
    %92 = arith.index_cast %91 : i32 to index
    %93 = memref.load %arg1[%92] : memref<32xi32, #tpu.memory_space<smem>>
    %94 = arith.index_cast %93 : i32 to index
    %c0_30 = arith.constant 0 : index
    %95 = vector.load %arg2[%94, %c0_30] : memref<64x128xf32, #tpu.memory_space<vmem>>, vector<1x128xf32>
    %c15 = arith.constant 15 : index
    %c0_31 = arith.constant 0 : index
    %96 = vector.load %arg3[%c15, %c0_31] : memref<32x128xf32, #tpu.memory_space<vmem>>, vector<1x128xf32>
    tpu.vector_store %arg3[%c15, %c0_31], %95 {strides = array<i32>} : memref<32x128xf32, #tpu.memory_space<vmem>>, vector<1x128xf32>,
    %c16_i32 = arith.constant 16 : i32
    %97 = arith.addi %0, %c16_i32 : i32
    %98 = arith.index_cast %97 : i32 to index
    %99 = memref.load %arg1[%98] : memref<32xi32, #tpu.memory_space<smem>>
    %100 = arith.index_cast %99 : i32 to index
    %c0_32 = arith.constant 0 : index
    %101 = vector.load %arg2[%100, %c0_32] : memref<64x128xf32, #tpu.memory_space<vmem>>, vector<1x128xf32>
    %c16 = arith.constant 16 : index
    %c0_33 = arith.constant 0 : index
    %102 = vector.load %arg3[%c16, %c0_33] : memref<32x128xf32, #tpu.memory_space<vmem>>, vector<1x128xf32>
    tpu.vector_store %arg3[%c16, %c0_33], %101 {strides = array<i32>} : memref<32x128xf32, #tpu.memory_space<vmem>>, vector<1x128xf32>,
    %c17_i32 = arith.constant 17 : i32
    %103 = arith.addi %0, %c17_i32 : i32
    %104 = arith.index_cast %103 : i32 to index
    %105 = memref.load %arg1[%104] : memref<32xi32, #tpu.memory_space<smem>>
    %106 = arith.index_cast %105 : i32 to index
    %c0_34 = arith.constant 0 : index
    %107 = vector.load %arg2[%106, %c0_34] : memref<64x128xf32, #tpu.memory_space<vmem>>, vector<1x128xf32>
    %c17 = arith.constant 17 : index
    %c0_35 = arith.constant 0 : index
    %108 = vector.load %arg3[%c17, %c0_35] : memref<32x128xf32, #tpu.memory_space<vmem>>, vector<1x128xf32>
    tpu.vector_store %arg3[%c17, %c0_35], %107 {strides = array<i32>} : memref<32x128xf32, #tpu.memory_space<vmem>>, vector<1x128xf32>,
    %c18_i32 = arith.constant 18 : i32
    %109 = arith.addi %0, %c18_i32 : i32
    %110 = arith.index_cast %109 : i32 to index
    %111 = memref.load %arg1[%110] : memref<32xi32, #tpu.memory_space<smem>>
    %112 = arith.index_cast %111 : i32 to index
    %c0_36 = arith.constant 0 : index
    %113 = vector.load %arg2[%112, %c0_36] : memref<64x128xf32, #tpu.memory_space<vmem>>, vector<1x128xf32>
    %c18 = arith.constant 18 : index
    %c0_37 = arith.constant 0 : index
    %114 = vector.load %arg3[%c18, %c0_37] : memref<32x128xf32, #tpu.memory_space<vmem>>, vector<1x128xf32>
    tpu.vector_store %arg3[%c18, %c0_37], %113 {strides = array<i32>} : memref<32x128xf32, #tpu.memory_space<vmem>>, vector<1x128xf32>,
    %c19_i32 = arith.constant 19 : i32
    %115 = arith.addi %0, %c19_i32 : i32
    %116 = arith.index_cast %115 : i32 to index
    %117 = memref.load %arg1[%116] : memref<32xi32, #tpu.memory_space<smem>>
    %118 = arith.index_cast %117 : i32 to index
    %c0_38 = arith.constant 0 : index
    %119 = vector.load %arg2[%118, %c0_38] : memref<64x128xf32, #tpu.memory_space<vmem>>, vector<1x128xf32>
    %c19 = arith.constant 19 : index
    %c0_39 = arith.constant 0 : index
    %120 = vector.load %arg3[%c19, %c0_39] : memref<32x128xf32, #tpu.memory_space<vmem>>, vector<1x128xf32>
    tpu.vector_store %arg3[%c19, %c0_39], %119 {strides = array<i32>} : memref<32x128xf32, #tpu.memory_space<vmem>>, vector<1x128xf32>,
    %c20_i32 = arith.constant 20 : i32
    %121 = arith.addi %0, %c20_i32 : i32
    %122 = arith.index_cast %121 : i32 to index
    %123 = memref.load %arg1[%122] : memref<32xi32, #tpu.memory_space<smem>>
    %124 = arith.index_cast %123 : i32 to index
    %c0_40 = arith.constant 0 : index
    %125 = vector.load %arg2[%124, %c0_40] : memref<64x128xf32, #tpu.memory_space<vmem>>, vector<1x128xf32>
    %c20 = arith.constant 20 : index
    %c0_41 = arith.constant 0 : index
    %126 = vector.load %arg3[%c20, %c0_41] : memref<32x128xf32, #tpu.memory_space<vmem>>, vector<1x128xf32>
    tpu.vector_store %arg3[%c20, %c0_41], %125 {strides = array<i32>} : memref<32x128xf32, #tpu.memory_space<vmem>>, vector<1x128xf32>,
    %c21_i32 = arith.constant 21 : i32
    %127 = arith.addi %0, %c21_i32 : i32
    %128 = arith.index_cast %127 : i32 to index
    %129 = memref.load %arg1[%128] : memref<32xi32, #tpu.memory_space<smem>>
    %130 = arith.index_cast %129 : i32 to index
    %c0_42 = arith.constant 0 : index
    %131 = vector.load %arg2[%130, %c0_42] : memref<64x128xf32, #tpu.memory_space<vmem>>, vector<1x128xf32>
    %c21 = arith.constant 21 : index
    %c0_43 = arith.constant 0 : index
    %132 = vector.load %arg3[%c21, %c0_43] : memref<32x128xf32, #tpu.memory_space<vmem>>, vector<1x128xf32>
    tpu.vector_store %arg3[%c21, %c0_43], %131 {strides = array<i32>} : memref<32x128xf32, #tpu.memory_space<vmem>>, vector<1x128xf32>,
    %c22_i32 = arith.constant 22 : i32
    %133 = arith.addi %0, %c22_i32 : i32
    %134 = arith.index_cast %133 : i32 to index
    %135 = memref.load %arg1[%134] : memref<32xi32, #tpu.memory_space<smem>>
    %136 = arith.index_cast %135 : i32 to index
    %c0_44 = arith.constant 0 : index
    %137 = vector.load %arg2[%136, %c0_44] : memref<64x128xf32, #tpu.memory_space<vmem>>, vector<1x128xf32>
    %c22 = arith.constant 22 : index
    %c0_45 = arith.constant 0 : index
    %138 = vector.load %arg3[%c22, %c0_45] : memref<32x128xf32, #tpu.memory_space<vmem>>, vector<1x128xf32>
    tpu.vector_store %arg3[%c22, %c0_45], %137 {strides = array<i32>} : memref<32x128xf32, #tpu.memory_space<vmem>>, vector<1x128xf32>,
    %c23_i32 = arith.constant 23 : i32
    %139 = arith.addi %0, %c23_i32 : i32
    %140 = arith.index_cast %139 : i32 to index
    %141 = memref.load %arg1[%140] : memref<32xi32, #tpu.memory_space<smem>>
    %142 = arith.index_cast %141 : i32 to index
    %c0_46 = arith.constant 0 : index
    %143 = vector.load %arg2[%142, %c0_46] : memref<64x128xf32, #tpu.memory_space<vmem>>, vector<1x128xf32>
    %c23 = arith.constant 23 : index
    %c0_47 = arith.constant 0 : index
    %144 = vector.load %arg3[%c23, %c0_47] : memref<32x128xf32, #tpu.memory_space<vmem>>, vector<1x128xf32>
    tpu.vector_store %arg3[%c23, %c0_47], %143 {strides = array<i32>} : memref<32x128xf32, #tpu.memory_space<vmem>>, vector<1x128xf32>,
    %c24_i32 = arith.constant 24 : i32
    %145 = arith.addi %0, %c24_i32 : i32
    %146 = arith.index_cast %145 : i32 to index
    %147 = memref.load %arg1[%146] : memref<32xi32, #tpu.memory_space<smem>>
    %148 = arith.index_cast %147 : i32 to index
    %c0_48 = arith.constant 0 : index
    %149 = vector.load %arg2[%148, %c0_48] : memref<64x128xf32, #tpu.memory_space<vmem>>, vector<1x128xf32>
    %c24 = arith.constant 24 : index
    %c0_49 = arith.constant 0 : index
    %150 = vector.load %arg3[%c24, %c0_49] : memref<32x128xf32, #tpu.memory_space<vmem>>, vector<1x128xf32>
    tpu.vector_store %arg3[%c24, %c0_49], %149 {strides = array<i32>} : memref<32x128xf32, #tpu.memory_space<vmem>>, vector<1x128xf32>,
    %c25_i32 = arith.constant 25 : i32
    %151 = arith.addi %0, %c25_i32 : i32
    %152 = arith.index_cast %151 : i32 to index
    %153 = memref.load %arg1[%152] : memref<32xi32, #tpu.memory_space<smem>>
    %154 = arith.index_cast %153 : i32 to index
    %c0_50 = arith.constant 0 : index
    %155 = vector.load %arg2[%154, %c0_50] : memref<64x128xf32, #tpu.memory_space<vmem>>, vector<1x128xf32>
    %c25 = arith.constant 25 : index
    %c0_51 = arith.constant 0 : index
    %156 = vector.load %arg3[%c25, %c0_51] : memref<32x128xf32, #tpu.memory_space<vmem>>, vector<1x128xf32>
    tpu.vector_store %arg3[%c25, %c0_51], %155 {strides = array<i32>} : memref<32x128xf32, #tpu.memory_space<vmem>>, vector<1x128xf32>,
    %c26_i32 = arith.constant 26 : i32
    %157 = arith.addi %0, %c26_i32 : i32
    %158 = arith.index_cast %157 : i32 to index
    %159 = memref.load %arg1[%158] : memref<32xi32, #tpu.memory_space<smem>>
    %160 = arith.index_cast %159 : i32 to index
    %c0_52 = arith.constant 0 : index
    %161 = vector.load %arg2[%160, %c0_52] : memref<64x128xf32, #tpu.memory_space<vmem>>, vector<1x128xf32>
    %c26 = arith.constant 26 : index
    %c0_53 = arith.constant 0 : index
    %162 = vector.load %arg3[%c26, %c0_53] : memref<32x128xf32, #tpu.memory_space<vmem>>, vector<1x128xf32>
    tpu.vector_store %arg3[%c26, %c0_53], %161 {strides = array<i32>} : memref<32x128xf32, #tpu.memory_space<vmem>>, vector<1x128xf32>,
    %c27_i32 = arith.constant 27 : i32
    %163 = arith.addi %0, %c27_i32 : i32
    %164 = arith.index_cast %163 : i32 to index
    %165 = memref.load %arg1[%164] : memref<32xi32, #tpu.memory_space<smem>>
    %166 = arith.index_cast %165 : i32 to index
    %c0_54 = arith.constant 0 : index
    %167 = vector.load %arg2[%166, %c0_54] : memref<64x128xf32, #tpu.memory_space<vmem>>, vector<1x128xf32>
    %c27 = arith.constant 27 : index
    %c0_55 = arith.constant 0 : index
    %168 = vector.load %arg3[%c27, %c0_55] : memref<32x128xf32, #tpu.memory_space<vmem>>, vector<1x128xf32>
    tpu.vector_store %arg3[%c27, %c0_55], %167 {strides = array<i32>} : memref<32x128xf32, #tpu.memory_space<vmem>>, vector<1x128xf32>,
    %c28_i32 = arith.constant 28 : i32
    %169 = arith.addi %0, %c28_i32 : i32
    %170 = arith.index_cast %169 : i32 to index
    %171 = memref.load %arg1[%170] : memref<32xi32, #tpu.memory_space<smem>>
    %172 = arith.index_cast %171 : i32 to index
    %c0_56 = arith.constant 0 : index
    %173 = vector.load %arg2[%172, %c0_56] : memref<64x128xf32, #tpu.memory_space<vmem>>, vector<1x128xf32>
    %c28 = arith.constant 28 : index
    %c0_57 = arith.constant 0 : index
    %174 = vector.load %arg3[%c28, %c0_57] : memref<32x128xf32, #tpu.memory_space<vmem>>, vector<1x128xf32>
    tpu.vector_store %arg3[%c28, %c0_57], %173 {strides = array<i32>} : memref<32x128xf32, #tpu.memory_space<vmem>>, vector<1x128xf32>,
    %c29_i32 = arith.constant 29 : i32
    %175 = arith.addi %0, %c29_i32 : i32
    %176 = arith.index_cast %175 : i32 to index
    %177 = memref.load %arg1[%176] : memref<32xi32, #tpu.memory_space<smem>>
    %178 = arith.index_cast %177 : i32 to index
    %c0_58 = arith.constant 0 : index
    %179 = vector.load %arg2[%178, %c0_58] : memref<64x128xf32, #tpu.memory_space<vmem>>, vector<1x128xf32>
    %c29 = arith.constant 29 : index
    %c0_59 = arith.constant 0 : index
    %180 = vector.load %arg3[%c29, %c0_59] : memref<32x128xf32, #tpu.memory_space<vmem>>, vector<1x128xf32>
    tpu.vector_store %arg3[%c29, %c0_59], %179 {strides = array<i32>} : memref<32x128xf32, #tpu.memory_space<vmem>>, vector<1x128xf32>,
    %c30_i32 = arith.constant 30 : i32
    %181 = arith.addi %0, %c30_i32 : i32
    %182 = arith.index_cast %181 : i32 to index
    %183 = memref.load %arg1[%182] : memref<32xi32, #tpu.memory_space<smem>>
    %184 = arith.index_cast %183 : i32 to index
    %c0_60 = arith.constant 0 : index
    %185 = vector.load %arg2[%184, %c0_60] : memref<64x128xf32, #tpu.memory_space<vmem>>, vector<1x128xf32>
    %c30 = arith.constant 30 : index
    %c0_61 = arith.constant 0 : index
    %186 = vector.load %arg3[%c30, %c0_61] : memref<32x128xf32, #tpu.memory_space<vmem>>, vector<1x128xf32>
    tpu.vector_store %arg3[%c30, %c0_61], %185 {strides = array<i32>} : memref<32x128xf32, #tpu.memory_space<vmem>>, vector<1x128xf32>,
    %c31_i32 = arith.constant 31 : i32
    %187 = arith.addi %0, %c31_i32 : i32
    %188 = arith.index_cast %187 : i32 to index
    %189 = memref.load %arg1[%188] : memref<32xi32, #tpu.memory_space<smem>>
    %190 = arith.index_cast %189 : i32 to index
    %c0_62 = arith.constant 0 : index
    %191 = vector.load %arg2[%190, %c0_62] : memref<64x128xf32, #tpu.memory_space<vmem>>, vector<1x128xf32>
    %c31 = arith.constant 31 : index
    %c0_63 = arith.constant 0 : index
    %192 = vector.load %arg3[%c31, %c0_63] : memref<32x128xf32, #tpu.memory_space<vmem>>, vector<1x128xf32>
    tpu.vector_store %arg3[%c31, %c0_63], %191 {strides = array<i32>} : memref<32x128xf32, #tpu.memory_space<vmem>>, vector<1x128xf32>,
    return
  }
  func.func @transform_0(%arg0: i32, %arg1: memref<32xi32, #tpu.memory_space<smem>>) -> (i32, i32) {
    %c0_i32 = arith.constant 0 : i32
    %c0_i32_0 = arith.constant 0 : i32
    %c0_i32_1 = arith.constant 0 : i32
    return %c0_i32, %c0_i32_0 : i32, i32
  }
  func.func @transform_1(%arg0: i32, %arg1: memref<32xi32, #tpu.memory_space<smem>>) -> (i32, i32) {
    %c0_i32 = arith.constant 0 : i32
    %c0_i32_0 = arith.constant 0 : i32
    return %arg0, %c0_i32 : i32, i32
  }
}

</mosaic_0001>

<bundles_post_ra>
// kernel: tpu_custom_call.1
= control target key start
LH: loop header
LB: loop body
LE: loop exit
PB: predicated region body
PF: predicated region fallthrough
CT: control target
= control target key end

     0   :  { %s327_s9 = smov [#allocation3]   ;;  %s362_s0 = inlined_call_operand.hbm [shape: s32[32], index: 0, kind: input, shape index: {}]   ;;  %s363_s1 = inlined_call_operand.hbm [shape: f32[64,128], index: 1, kind: input, shape index: {}]   ;;  %s364_s2 = inlined_call_operand.hbm [shape: f32[32,128], index: 2, kind: output, shape index: {}]  }
   0x1   :  { %8 = dma.hbm_to_smem %s362_s0, 16, %s327_s9, [#allocation2] }
   0x2   :  { %321 = dma.done.wait [#allocation2], 16 }
   0x3   :  { %322 = vsyncadd [#allocation2], 4294967280 }
   0x4   :  { %10 = sfence }
   0x5   :  { %11 = vsyncpa [#allocation5], 0 }
   0x6   :  { %12 = vsyncpa [#allocation6], 0  ;;  %s328_s12 = smov [#allocation4]  }
   0x7   :  { %s18_s13 = sshll.u32 %s328_s12, 4  ;;  %s19_s13 = int_to_ptr.vmem [resolvable:$true] %s18_s13 }
   0x8   :  { %s289_s14 = scalar_lea.vmem %s19_s13, 1024  ;;  %p294_p1 = scmp.lt.s32.totalorder %s19_s13, %s19_s13 }
   0x9   :  { %p290_p0 = scmp.ne.s32.totalorder %s19_s13, %s289_s14  ;;  %p295_p2 = scmp.lt.s32.totalorder %s289_s14, %s289_s14 }
   0xb   :  { %p296_p3 = por %p295_p2, %p294_p1 }
   0xd   :  { %p297_p4 = pnand %p296_p3, %p290_p0 }
   0xf   :  { %300 = shalt.err (!%p297_p4)
}
  0x10   :  { %s329_s15 = smov 128   ;;  %s330_s16 = smov 8  }
  0x11   :  { %24 = dma.hbm_to_vmem [thread:$0]  %s363_s1, 1024, %s19_s13, [#allocation5], %s329_s15, %s329_s15, %s330_s16  }
  0x12   :  { %323 = dma.done.wait [#allocation5], 1024  }
  0x13   :  { %324 = vsyncadd [#allocation5], 4294966272  ;;  %s29_s18 = sld [smem:[#allocation3]] }
  0x14   :  { %s237_s19 = sld [smem:[#allocation3 + $0x1]] }
  0x15   :  { %s238_s20 = sld [smem:[#allocation3 + $0x2]] }
  0x16   :  { %s239_s21 = sld [smem:[#allocation3 + $0x3]] }
  0x17   :  { %s240_s22 = sld [smem:[#allocation3 + $0x4]] }
  0x18   :  { %s241_s23 = sld [smem:[#allocation3 + $0x5]] }
  0x19   :  { %s242_s24 = sld [smem:[#allocation3 + $0x6]]  ;;  %s30_s25 = scalar_lea.vmem [#allocation4], %s29_s18 }
  0x1a   :  { %v31_v0 = vld [vmem:[%s30_s25] sm:$0x1]  ;;  %s243_s26 = sld [smem:[#allocation3 + $0x7]]  ;;  %s35_s27 = scalar_lea.vmem [#allocation4], %s237_s19 }
  0x1b   :  { %32 = vst [vmem:[#allocation7] sm:$0x1] %v31_v0  ;;  %v36_v1 = vld [vmem:[%s35_s27] sm:$0x1]  ;;  %s244_s28 = sld [smem:[#allocation3 + $0x8]]  ;;  %s40_s29 = scalar_lea.vmem [#allocation4], %s238_s20 }
  0x1c   :  { %37 = vst [vmem:[#allocation7 + $0x1] sm:$0x1] %v36_v1  ;;  %v41_v2 = vld [vmem:[%s40_s29] sm:$0x1]  ;;  %s245_s1 = sld [smem:[#allocation3 + $0x9]]  ;;  %s45_s30 = scalar_lea.vmem [#allocation4], %s239_s21 }
  0x1d   :  { %42 = vst [vmem:[#allocation7 + $0x2] sm:$0x1] %v41_v2  ;;  %v46_v3 = vld [vmem:[%s45_s30] sm:$0x1]  ;;  %s246_s3 = sld [smem:[#allocation3 + $0xa]]  ;;  %s50_s4 = scalar_lea.vmem [#allocation4], %s240_s22 }
  0x1e   :  { %47 = vst [vmem:[#allocation7 + $0x3] sm:$0x1] %v46_v3  ;;  %v51_v4 = vld [vmem:[%s50_s4] sm:$0x1]  ;;  %s247_s5 = sld [smem:[#allocation3 + $0xb]]  ;;  %s55_s6 = scalar_lea.vmem [#allocation4], %s241_s23 }
  0x1f   :  { %52 = vst [vmem:[#allocation7 + $0x4] sm:$0x1] %v51_v4  ;;  %v56_v5 = vld [vmem:[%s55_s6] sm:$0x1]  ;;  %s248_s7 = sld [smem:[#allocation3 + $0xc]]  ;;  %s60_s8 = scalar_lea.vmem [#allocation4], %s242_s24 }
  0x20   :  { %57 = vst [vmem:[#allocation7 + $0x5] sm:$0x1] %v56_v5  ;;  %v61_v6 = vld [vmem:[%s60_s8] sm:$0x1]  ;;  %s249_s9 = sld [smem:[#allocation3 + $0xd]]  ;;  %s65_s10 = scalar_lea.vmem [#allocation4], %s243_s26 }
  0x21   :  { %62 = vst [vmem:[#allocation7 + $0x6] sm:$0x1] %v61_v6  ;;  %v66_v7 = vld [vmem:[%s65_s10] sm:$0x1]  ;;  %s250_s11 = sld [smem:[#allocation3 + $0xe]]  ;;  %s70_s12 = scalar_lea.vmem [#allocation4], %s244_s28 }
  0x22   :  { %67 = vst [vmem:[#allocation7 + $0x7] sm:$0x1] %v66_v7  ;;  %v71_v8 = vld [vmem:[%s70_s12] sm:$0x1]  ;;  %s251_s13 = sld [smem:[#allocation3 + $0xf]]  ;;  %s75_s14 = scalar_lea.vmem [#allocation4], %s245_s1 }
  0x23   :  { %72 = vst [vmem:[#allocation7 + $0x8] sm:$0x1] %v71_v8  ;;  %v76_v9 = vld [vmem:[%s75_s14] sm:$0x1]  ;;  %s252_s0 = sld [smem:[#allocation3 + $0x10]]  ;;  %s80_s17 = scalar_lea.vmem [#allocation4], %s246_s3 }
  0x24   :  { %77 = vst [vmem:[#allocation7 + $0x9] sm:$0x1] %v76_v9  ;;  %v81_v10 = vld [vmem:[%s80_s17] sm:$0x1]  ;;  %s253_s18 = sld [smem:[#allocation3 + $0x11]]  ;;  %s85_s19 = scalar_lea.vmem [#allocation4], %s247_s5 }
  0x25   :  { %82 = vst [vmem:[#allocation7 + $0xa] sm:$0x1] %v81_v10  ;;  %v86_v11 = vld [vmem:[%s85_s19] sm:$0x1]  ;;  %s254_s20 = sld [smem:[#allocation3 + $0x12]]  ;;  %s90_s21 = scalar_lea.vmem [#allocation4], %s248_s7 }
  0x26   :  { %87 = vst [vmem:[#allocation7 + $0xb] sm:$0x1] %v86_v11  ;;  %v91_v12 = vld [vmem:[%s90_s21] sm:$0x1]  ;;  %s255_s22 = sld [smem:[#allocation3 + $0x13]]  ;;  %s95_s23 = scalar_lea.vmem [#allocation4], %s249_s9 }
  0x27   :  { %92 = vst [vmem:[#allocation7 + $0xc] sm:$0x1] %v91_v12  ;;  %v96_v13 = vld [vmem:[%s95_s23] sm:$0x1]  ;;  %s256_s24 = sld [smem:[#allocation3 + $0x14]]  ;;  %s100_s25 = scalar_lea.vmem [#allocation4], %s250_s11 }
  0x28   :  { %97 = vst [vmem:[#allocation7 + $0xd] sm:$0x1] %v96_v13  ;;  %v101_v14 = vld [vmem:[%s100_s25] sm:$0x1]  ;;  %s257_s26 = sld [smem:[#allocation3 + $0x15]]  ;;  %s105_s27 = scalar_lea.vmem [#allocation4], %s251_s13 }
  0x29   :  { %102 = vst [vmem:[#allocation7 + $0xe] sm:$0x1] %v101_v14  ;;  %v106_v15 = vld [vmem:[%s105_s27] sm:$0x1]  ;;  %s258_s28 = sld [smem:[#allocation3 + $0x16]]  ;;  %s110_s29 = scalar_lea.vmem [#allocation4], %s252_s0 }
  0x2a   :  { %107 = vst [vmem:[#allocation7 + $0xf] sm:$0x1] %v106_v15  ;;  %v111_v16 = vld [vmem:[%s110_s29] sm:$0x1]  ;;  %s259_s1 = sld [smem:[#allocation3 + $0x17]]  ;;  %s115_s30 = scalar_lea.vmem [#allocation4], %s253_s18 }
  0x2b   :  { %112 = vst [vmem:[#allocation7 + $0x10] sm:$0x1] %v111_v16  ;;  %v116_v17 = vld [vmem:[%s115_s30] sm:$0x1]  ;;  %s260_s3 = sld [smem:[#allocation3 + $0x18]]  ;;  %s120_s4 = scalar_lea.vmem [#allocation4], %s254_s20 }
  0x2c   :  { %117 = vst [vmem:[#allocation7 + $0x11] sm:$0x1] %v116_v17  ;;  %v121_v18 = vld [vmem:[%s120_s4] sm:$0x1]  ;;  %s261_s5 = sld [smem:[#allocation3 + $0x19]]  ;;  %s125_s6 = scalar_lea.vmem [#allocation4], %s255_s22 }
  0x2d   :  { %122 = vst [vmem:[#allocation7 + $0x12] sm:$0x1] %v121_v18  ;;  %v126_v19 = vld [vmem:[%s125_s6] sm:$0x1]  ;;  %s262_s7 = sld [smem:[#allocation3 + $0x1a]]  ;;  %s130_s8 = scalar_lea.vmem [#allocation4], %s256_s24 }
  0x2e   :  { %127 = vst [vmem:[#allocation7 + $0x13] sm:$0x1] %v126_v19  ;;  %v131_v20 = vld [vmem:[%s130_s8] sm:$0x1]  ;;  %s263_s9 = sld [smem:[#allocation3 + $0x1b]]  ;;  %s135_s10 = scalar_lea.vmem [#allocation4], %s257_s26 }
  0x2f   :  { %132 = vst [vmem:[#allocation7 + $0x14] sm:$0x1] %v131_v20  ;;  %v136_v21 = vld [vmem:[%s135_s10] sm:$0x1]  ;;  %s264_s11 = sld [smem:[#allocation3 + $0x1c]]  ;;  %s140_s12 = scalar_lea.vmem [#allocation4], %s258_s28 }
  0x30   :  { %137 = vst [vmem:[#allocation7 + $0x15] sm:$0x1] %v136_v21  ;;  %v141_v22 = vld [vmem:[%s140_s12] sm:$0x1]  ;;  %s265_s13 = sld [smem:[#allocation3 + $0x1d]]  ;;  %s145_s14 = scalar_lea.vmem [#allocation4], %s259_s1 }
  0x31   :  { %142 = vst [vmem:[#allocation7 + $0x16] sm:$0x1] %v141_v22  ;;  %v146_v23 = vld [vmem:[%s145_s14] sm:$0x1]  ;;  %s266_s0 = sld [smem:[#allocation3 + $0x1e]]  ;;  %s150_s17 = scalar_lea.vmem [#allocation4], %s260_s3 }
  0x32   :  { %147 = vst [vmem:[#allocation7 + $0x17] sm:$0x1] %v146_v23  ;;  %v151_v24 = vld [vmem:[%s150_s17] sm:$0x1]  ;;  %s267_s18 = sld [smem:[#allocation3 + $0x1f]]  ;;  %s155_s19 = scalar_lea.vmem [#allocation4], %s261_s5 }
  0x33   :  { %152 = vst [vmem:[#allocation7 + $0x18] sm:$0x1] %v151_v24  ;;  %v156_v25 = vld [vmem:[%s155_s19] sm:$0x1]  ;;  %s160_s20 = scalar_lea.vmem [#allocation4], %s262_s7  ;;  %s331_s22 = smov [#allocation7]  }
  0x34   :  { %157 = vst [vmem:[#allocation7 + $0x19] sm:$0x1] %v156_v25  ;;  %v161_v26 = vld [vmem:[%s160_s20] sm:$0x1]  ;;  %s165_s21 = scalar_lea.vmem [#allocation4], %s263_s9  ;;  %s193_s23 = sshll.u32 %s331_s22, 4  ;;  %s194_s23 = int_to_ptr.vmem [resolvable:$true] %s193_s23 }
  0x35   :  { %162 = vst [vmem:[#allocation7 + $0x1a] sm:$0x1] %v161_v26  ;;  %v166_v27 = vld [vmem:[%s165_s21] sm:$0x1]  ;;  %s170_s24 = scalar_lea.vmem [#allocation4], %s264_s11  ;;  %s301_s28 = scalar_lea.vmem %s194_s23, 512 }
  0x36   :  { %167 = vst [vmem:[#allocation7 + $0x1b] sm:$0x1] %v166_v27  ;;  %v171_v28 = vld [vmem:[%s170_s24] sm:$0x1]  ;;  %s175_s25 = scalar_lea.vmem [#allocation4], %s265_s13  ;;  %p302_p5 = scmp.ne.s32.totalorder %s194_s23, %s301_s28 }
  0x37   :  { %172 = vst [vmem:[#allocation7 + $0x1c] sm:$0x1] %v171_v28  ;;  %v176_v29 = vld [vmem:[%s175_s25] sm:$0x1]  ;;  %s180_s26 = scalar_lea.vmem [#allocation4], %s266_s0  ;;  %p306_p6 = scmp.lt.s32.totalorder %s194_s23, %s194_s23 }
  0x38   :  { %177 = vst [vmem:[#allocation7 + $0x1d] sm:$0x1] %v176_v29  ;;  %v181_v30 = vld [vmem:[%s180_s26] sm:$0x1]  ;;  %s185_s27 = scalar_lea.vmem [#allocation4], %s267_s18  ;;  %p307_p7 = scmp.lt.s32.totalorder %s301_s28, %s301_s28 }
  0x39   :  { %182 = vst [vmem:[#allocation7 + $0x1e] sm:$0x1] %v181_v30  ;;  %v186_v31 = vld [vmem:[%s185_s27] sm:$0x1] }
  0x3a   :  { %187 = vst [vmem:[#allocation7 + $0x1f] sm:$0x1] %v186_v31  ;;  %p308_p8 = por %p307_p7, %p306_p6 }
  0x3c   :  { %p309_p9 = pnand %p308_p8, %p302_p5 }
  0x3e   :  { %312 = shalt.err (!%p309_p9)
}
  0x3f   :  { %199 = dma.vmem_to_hbm [thread:$0]  %s194_s23, 512, %s364_s2, [#allocation6], %s329_s15, %s329_s15, %s330_s16  }
  0x40   :  { %325 = dma.done.wait [#allocation6], 512  }
  0x41   :  { %326 = vsyncadd [#allocation6], 4294966784 }
  0x42   :  { %203 = vsyncpa [#allocation5], 1 }
  0x43   :  { %204 = vsyncpa [#allocation6], 1 }

</bundles_post_ra>
